<compile_context>
chip_gen: v7x
topology: tpu7x:2x2x1
jax: 0.10.0
libtpu: 0.0.40
codegen_flags: <defaults>
</compile_context>

<pallas_src>
import functools

import jax
import jax.numpy as jnp
from jax.experimental import pallas as pl
from jax.experimental.pallas import tpu as pltpu

_BN_EPS = 0.001
_SLOPE = 0.2
_LANE = 128


def _decoder_kernel(xc_ref, wbig_ref, scale_ref, b1_ref, w2h_ref, b2_ref,
                    w3_ref, b3_ref, out_ref):
    """3 MXU dots (bf16 operands, f32 accumulate) + BN scale/shift + LeakyReLU."""
    slope = jnp.float32(_SLOPE)
    H = w2h_ref.shape[0]

    # In-kernel cast (free VPU work) instead of a separate XLA cast pass.
    xc = xc_ref[...].astype(jnp.bfloat16)          # [TB, L+C]
    scale = scale_ref[...]                          # [1, H] f32 BN scale

    # Fused first dot: [x@W1x + c@W1c | c@W2c]  ->  (TB, 2H) f32.
    t = jnp.dot(xc, wbig_ref[...], preferred_element_type=jnp.float32)

    # Layer 1: BN as f32 scale/shift applied to the accumulator.
    h1 = t[:, :H] * scale + b1_ref[...]
    # LeakyReLU(0.2): max(h, slope*h) valid because slope in (0, 1).
    h1 = jnp.maximum(h1, slope * h1).astype(jnp.bfloat16)

    # Layer 2: h1 @ W2h + (c @ W2c taken from the fused dot), same shared BN.
    c2 = t[:, H:]
    h2 = (jnp.dot(h1, w2h_ref[...], preferred_element_type=jnp.float32) + c2)
    h2 = h2 * scale + b2_ref[...]
    h2 = jnp.maximum(h2, slope * h2).astype(jnp.bfloat16)

    # Output layer (columns zero-padded to a multiple of 128 -> lane-dense stores).
    out_ref[...] = (jnp.dot(h2, w3_ref[...], preferred_element_type=jnp.float32)
                    + b3_ref[...])


def prepare_decoder_params(params):
    """One-time prep (outside the per-call jit): BN fold, weight fusion, bf16, padding."""
    L = params["w1x"].shape[0]
    C = params["w1c"].shape[0]
    H = params["w2h"].shape[0]
    D = params["w3"].shape[1]
    d_pad = max(_LANE, ((D + _LANE - 1) // _LANE) * _LANE)

    # Eval-mode BN:  BN(z) = (z - rm) * gamma/sqrt(rv+eps) + beta
    scale = params["gamma"] / jnp.sqrt(params["rv"] + _BN_EPS)      # [1, H] f32
    b1f = (params["b1"] - params["rm"]) * scale + params["beta"]    # [1, H] f32
    b2f = (params["b2"] - params["rm"]) * scale + params["beta"]    # [1, H] f32

    # Fused weight  W_big = [[W1x | 0], [W1c | W2c]]  -> (L+C, 2H), plain bf16
    # (the BN scale is applied to the f32 accumulator, not folded into bf16 weights).
    top = jnp.concatenate([params["w1x"], jnp.zeros((L, H), jnp.float32)], axis=1)
    bot = jnp.concatenate([params["w1c"], params["w2c"]], axis=1)
    w_big = jnp.concatenate([top, bot], axis=0).astype(jnp.bfloat16)

    # Lane-dense output weights/bias.
    w3p = jnp.zeros((H, d_pad), jnp.float32).at[:, :D].set(params["w3"])
    b3p = jnp.zeros((1, d_pad), jnp.float32).at[:, :D].set(params["b3"])

    return {
        "w_big": w_big,
        "scale": scale,
        "b1": b1f,
        "w2h": params["w2h"].astype(jnp.bfloat16),
        "b2": b2f,
        "w3": w3p.astype(jnp.bfloat16),
        "b3": b3p,
        "log_theta": params["log_theta"],
    }


@functools.partial(jax.jit, static_argnames=("out_dim",))
def decoder_forward(x, c, p, *, out_dim):
    B = x.shape[0]
    lc = x.shape[1] + c.shape[1]
    d_pad = p["w3"].shape[1]

    # Concat is done in the wrapper (free XLA fusion, no in-kernel lane movement).
    xc = jnp.concatenate([x, c], axis=1)            # [B, L+C] f32

    # Batch tiling: one tile for small B; for large B keep tiles big while
    # guaranteeing grid >= 2 so the "parallel" axis shards over v7x's 2 TCs.
    if B <= 512:
        tile_b = B
    else:
        tile_b = min(2048, ((B + 1) // 2 + 7) // 8 * 8)
        tile_b = min(tile_b, B)
    grid = (pl.cdiv(B, tile_b),)

    def batched(feat):
        return pl.BlockSpec((tile_b, feat), lambda i: (i, 0))

    def resident(arr):
        # Same block every grid step -> stays resident in VMEM.
        return pl.BlockSpec(arr.shape, lambda i: (0, 0))

    out = pl.pallas_call(
        _decoder_kernel,
        out_shape=jax.ShapeDtypeStruct((B, d_pad), jnp.float32),
        grid=grid,
        in_specs=[batched(lc),
                  resident(p["w_big"]), resident(p["scale"]), resident(p["b1"]),
                  resident(p["w2h"]), resident(p["b2"]),
                  resident(p["w3"]), resident(p["b3"])],
        out_specs=batched(d_pad),
        compiler_params=pltpu.CompilerParams(
            dimension_semantics=("parallel",)),
    )(xc, p["w_big"], p["scale"], p["b1"], p["w2h"], p["b2"], p["w3"], p["b3"])

    log_x_hat = out if out_dim == d_pad else out[:, :out_dim]
    # log_theta.expand(B, -1): constant broadcast -> plain XLA.
    log_theta = jnp.broadcast_to(p["log_theta"], (B, out_dim))
    return log_x_hat, log_theta


def _ref_forward_f32(x, c, p):
    """Pure-JAX f32 reference (PyTorch eval-mode semantics)."""
    inv_std = 1.0 / jnp.sqrt(p["rv"] + _BN_EPS)
    h = x @ p["w1x"] + c @ p["w1c"] + p["b1"]
    h = (h - p["rm"]) * inv_std * p["gamma"] + p["beta"]
    h = jnp.where(h >= 0, h, _SLOPE * h)
    h2 = h @ p["w2h"] + c @ p["w2c"] + p["b2"]
    h2 = (h2 - p["rm"]) * inv_std * p["gamma"] + p["beta"]
    h2 = jnp.where(h2 >= 0, h2, _SLOPE * h2)
    log_x_hat = h2 @ p["w3"] + p["b3"]
    log_theta = jnp.broadcast_to(p["log_theta"], log_x_hat.shape)
    return log_x_hat, log_theta


def _ref_forward_kernel_numerics(x, c, prep, out_dim):
    """Reference that mirrors the kernel's numerics (fused bf16 dots, f32 BN scale)."""
    H = prep["w2h"].shape[0]
    xc = jnp.concatenate([x, c], axis=1).astype(jnp.bfloat16)
    t = jnp.dot(xc, prep["w_big"], preferred_element_type=jnp.float32)
    h1 = t[:, :H] * prep["scale"] + prep["b1"]
    h1 = jnp.maximum(h1, _SLOPE * h1).astype(jnp.bfloat16)
    h2 = (jnp.dot(h1, prep["w2h"], preferred_element_type=jnp.float32) + t[:, H:])
    h2 = h2 * prep["scale"] + prep["b2"]
    h2 = jnp.maximum(h2, _SLOPE * h2).astype(jnp.bfloat16)
    out = jnp.dot(h2, prep["w3"], preferred_element_type=jnp.float32) + prep["b3"]
    return out[:, :out_dim]


def init_params(key, output_dim, condition_dim, hidden_dim, latent_dim):
    """Deterministic synthetic init matching the PyTorch parameter shapes.

    nn.Linear weights are (out, in); stored pre-transposed as (in, out) with the
    concat dimension split into operand blocks (W = [Wx | Wc] / [Wh | Wc]).
    """
    ks = jax.random.split(key, 6)
    s = lambda fan_in: 1.0 / jnp.sqrt(jnp.float32(fan_in))

    w1 = jax.random.uniform(ks[0], (latent_dim + condition_dim, hidden_dim),
                            jnp.float32, -1, 1) * s(latent_dim + condition_dim)
    w2 = jax.random.uniform(ks[1], (hidden_dim + condition_dim, hidden_dim),
                            jnp.float32, -1, 1) * s(hidden_dim + condition_dim)
    w3 = jax.random.uniform(ks[2], (hidden_dim, output_dim),
                            jnp.float32, -1, 1) * s(hidden_dim)
    b1 = jax.random.uniform(ks[3], (1, hidden_dim), jnp.float32, -1, 1) * s(
        latent_dim + condition_dim)
    b2 = jax.random.uniform(ks[4], (1, hidden_dim), jnp.float32, -1, 1) * s(
        hidden_dim + condition_dim)
    b3 = jax.random.uniform(ks[5], (1, output_dim), jnp.float32, -1, 1) * s(
        hidden_dim)

    return {
        "w1x": w1[:latent_dim], "w1c": w1[latent_dim:], "b1": b1,
        "w2h": w2[:hidden_dim], "w2c": w2[hidden_dim:], "b2": b2,
        "w3": w3, "b3": b3,
        # Single shared BatchNorm1d(hidden_dim), freshly initialized.
        "gamma": jnp.ones((1, hidden_dim), jnp.float32),
        "beta": jnp.zeros((1, hidden_dim), jnp.float32),
        "rm": jnp.zeros((1, hidden_dim), jnp.float32),
        "rv": jnp.ones((1, hidden_dim), jnp.float32),
        # nn.Parameter(torch.zeros(output_dim))
        "log_theta": jnp.zeros((1, output_dim), jnp.float32),
    }


if __name__ == "__main__":
    B, latent_dim, condition_dim, hidden_dim, output_dim = 8, 16, 8, 32, 64

    key = jax.random.PRNGKey(0)
    kx, kc, kp = jax.random.split(key, 3)
    x = jax.random.normal(kx, (B, latent_dim), jnp.float32)
    c = jax.random.normal(kc, (B, condition_dim), jnp.float32)
    params = init_params(kp, output_dim, condition_dim, hidden_dim, latent_dim)

    # One-time parameter prep, outside the per-call jitted path.
    prepared = prepare_decoder_params(params)

    log_x_hat, log_theta = decoder_forward(x, c, prepared, out_dim=output_dim)
    jax.block_until_ready((log_x_hat, log_theta))

    assert log_x_hat.shape == (B, output_dim)
    assert log_theta.shape == (B, output_dim)

    # Tight check against a reference with identical numerics (fused bf16 dots).
    ref_kernel = _ref_forward_kernel_numerics(x, c, prepared, output_dim)
    assert jnp.allclose(log_x_hat, ref_kernel, atol=1e-4, rtol=1e-4)

    # f32 reference (PyTorch eval semantics) — loose tolerance for bf16 matmuls.
    ref_mean, ref_theta = _ref_forward_f32(x, c, params)
    assert jnp.allclose(log_x_hat, ref_mean, atol=5e-2, rtol=5e-2)
    assert jnp.allclose(log_theta, ref_theta, atol=1e-6)

    print("KERNEL_OK")
</pallas_src>

<mosaic_0001>
module attributes {stable_mosaic.version = 11 : i64} {
  func.func @_decoder_kernel(%arg0: i32, %arg1: memref<8x24xf32, #tpu.memory_space<vmem>>, %arg2: memref<24x64xbf16, #tpu.memory_space<vmem>>, %arg3: memref<1x32xf32, #tpu.memory_space<vmem>>, %arg4: memref<1x32xf32, #tpu.memory_space<vmem>>, %arg5: memref<32x32xbf16, #tpu.memory_space<vmem>>, %arg6: memref<1x32xf32, #tpu.memory_space<vmem>>, %arg7: memref<32x128xbf16, #tpu.memory_space<vmem>>, %arg8: memref<1x128xf32, #tpu.memory_space<vmem>>, %arg9: memref<8x128xf32, #tpu.memory_space<vmem>>) attributes {dimension_semantics = [#tpu.dimension_semantics<parallel>], iteration_bounds = array<i64: 1>, scalar_prefetch = 0 : i64, scratch_operands = 0 : i64, tpu.core_type = #tpu.core_type<tc>, window_params = [{transform_indices = @transform_0, window_bounds = array<i64: 8, 24>}, {pipeline_mode = #tpu.pipeline_mode<synchronous>, transform_indices = @transform_1, window_bounds = array<i64: 24, 64>}, {pipeline_mode = #tpu.pipeline_mode<synchronous>, transform_indices = @transform_2, window_bounds = array<i64: 1, 32>}, {pipeline_mode = #tpu.pipeline_mode<synchronous>, transform_indices = @transform_3, window_bounds = array<i64: 1, 32>}, {pipeline_mode = #tpu.pipeline_mode<synchronous>, transform_indices = @transform_4, window_bounds = array<i64: 32, 32>}, {pipeline_mode = #tpu.pipeline_mode<synchronous>, transform_indices = @transform_5, window_bounds = array<i64: 1, 32>}, {pipeline_mode = #tpu.pipeline_mode<synchronous>, transform_indices = @transform_6, window_bounds = array<i64: 32, 128>}, {pipeline_mode = #tpu.pipeline_mode<synchronous>, transform_indices = @transform_7, window_bounds = array<i64: 1, 128>}, {transform_indices = @transform_8, window_bounds = array<i64: 8, 128>}]} {
    %c0 = arith.constant 0 : index
    %c0_0 = arith.constant 0 : index
    %0 = vector.load %arg1[%c0, %c0_0] : memref<8x24xf32, #tpu.memory_space<vmem>>, vector<8x24xf32>
    %1 = arith.truncf %0 : vector<8x24xf32> to vector<8x24xbf16>
    %c0_1 = arith.constant 0 : index
    %c0_2 = arith.constant 0 : index
    %2 = vector.load %arg3[%c0_1, %c0_2] : memref<1x32xf32, #tpu.memory_space<vmem>>, vector<1x32xf32>
    %c0_3 = arith.constant 0 : index
    %c0_4 = arith.constant 0 : index
    %3 = vector.load %arg2[%c0_3, %c0_4] : memref<24x64xbf16, #tpu.memory_space<vmem>>, vector<24x64xbf16>
    %cst = arith.constant dense<0.000000e+00> : vector<8x64xf32>
    %4 = tpu.matmul %1, %3, %cst {dimension_numbers = #tpu.dot_dimension_numbers<[1], [0], [0], [1], [0, 0, 1, 1], [], []>} : vector<8x24xbf16>, vector<24x64xbf16>, vector<8x64xf32> -> vector<8x64xf32>
    %5 = vector.extract_strided_slice %4 {offsets = [0, 0], sizes = [8, 32], strides = [1, 1]} : vector<8x64xf32> to vector<8x32xf32>
    %6 = vector.broadcast %2 : vector<1x32xf32> to vector<8x32xf32>
    %7 = arith.mulf %5, %6 : vector<8x32xf32>
    %c0_5 = arith.constant 0 : index
    %c0_6 = arith.constant 0 : index
    %8 = vector.load %arg4[%c0_5, %c0_6] : memref<1x32xf32, #tpu.memory_space<vmem>>, vector<1x32xf32>
    %9 = vector.broadcast %8 : vector<1x32xf32> to vector<8x32xf32>
    %10 = arith.addf %7, %9 : vector<8x32xf32>
    %cst_7 = arith.constant 2.000000e-01 : f32
    %11 = vector.broadcast %cst_7 : f32 to vector<8x32xf32>
    %12 = arith.mulf %11, %10 : vector<8x32xf32>
    %13 = arith.maximumf %10, %12 : vector<8x32xf32>
    %14 = arith.truncf %13 : vector<8x32xf32> to vector<8x32xbf16>
    %15 = vector.extract_strided_slice %4 {offsets = [0, 32], sizes = [8, 32], strides = [1, 1]} : vector<8x64xf32> to vector<8x32xf32>
    %c0_8 = arith.constant 0 : index
    %c0_9 = arith.constant 0 : index
    %16 = vector.load %arg5[%c0_8, %c0_9] : memref<32x32xbf16, #tpu.memory_space<vmem>>, vector<32x32xbf16>
    %cst_10 = arith.constant dense<0.000000e+00> : vector<8x32xf32>
    %17 = tpu.matmul %14, %16, %cst_10 {dimension_numbers = #tpu.dot_dimension_numbers<[1], [0], [0], [1], [0, 0, 1, 1], [], []>} : vector<8x32xbf16>, vector<32x32xbf16>, vector<8x32xf32> -> vector<8x32xf32>
    %18 = arith.addf %17, %15 : vector<8x32xf32>
    %19 = vector.broadcast %2 : vector<1x32xf32> to vector<8x32xf32>
    %20 = arith.mulf %18, %19 : vector<8x32xf32>
    %c0_11 = arith.constant 0 : index
    %c0_12 = arith.constant 0 : index
    %21 = vector.load %arg6[%c0_11, %c0_12] : memref<1x32xf32, #tpu.memory_space<vmem>>, vector<1x32xf32>
    %22 = vector.broadcast %21 : vector<1x32xf32> to vector<8x32xf32>
    %23 = arith.addf %20, %22 : vector<8x32xf32>
    %cst_13 = arith.constant 2.000000e-01 : f32
    %24 = vector.broadcast %cst_13 : f32 to vector<8x32xf32>
    %25 = arith.mulf %24, %23 : vector<8x32xf32>
    %26 = arith.maximumf %23, %25 : vector<8x32xf32>
    %27 = arith.truncf %26 : vector<8x32xf32> to vector<8x32xbf16>
    %c0_14 = arith.constant 0 : index
    %c0_15 = arith.constant 0 : index
    %28 = vector.load %arg7[%c0_14, %c0_15] : memref<32x128xbf16, #tpu.memory_space<vmem>>, vector<32x128xbf16>
    %cst_16 = arith.constant dense<0.000000e+00> : vector<8x128xf32>
    %29 = tpu.matmul %27, %28, %cst_16 {dimension_numbers = #tpu.dot_dimension_numbers<[1], [0], [0], [1], [0, 0, 1, 1], [], []>} : vector<8x32xbf16>, vector<32x128xbf16>, vector<8x128xf32> -> vector<8x128xf32>
    %c0_17 = arith.constant 0 : index
    %c0_18 = arith.constant 0 : index
    %30 = vector.load %arg8[%c0_17, %c0_18] : memref<1x128xf32, #tpu.memory_space<vmem>>, vector<1x128xf32>
    %31 = vector.broadcast %30 : vector<1x128xf32> to vector<8x128xf32>
    %32 = arith.addf %29, %31 : vector<8x128xf32>
    %c0_19 = arith.constant 0 : index
    %c0_20 = arith.constant 0 : index
    %33 = vector.load %arg9[%c0_19, %c0_20] : memref<8x128xf32, #tpu.memory_space<vmem>>, vector<8x128xf32>
    tpu.vector_store %arg9[%c0_19, %c0_20], %32 {strides = array<i32>} : memref<8x128xf32, #tpu.memory_space<vmem>>, vector<8x128xf32>,
    return
  }
  func.func @transform_0(%arg0: i32) -> (i32, i32) {
    %c0_i32 = arith.constant 0 : i32
    %c0_i32_0 = arith.constant 0 : i32
    return %arg0, %c0_i32 : i32, i32
  }
  func.func @transform_1(%arg0: i32) -> (i32, i32) {
    %c0_i32 = arith.constant 0 : i32
    %c0_i32_0 = arith.constant 0 : i32
    %c0_i32_1 = arith.constant 0 : i32
    return %c0_i32, %c0_i32_0 : i32, i32
  }
  func.func @transform_2(%arg0: i32) -> (i32, i32) {
    %c0_i32 = arith.constant 0 : i32
    %c0_i32_0 = arith.constant 0 : i32
    %c0_i32_1 = arith.constant 0 : i32
    return %c0_i32, %c0_i32_0 : i32, i32
  }
  func.func @transform_3(%arg0: i32) -> (i32, i32) {
    %c0_i32 = arith.constant 0 : i32
    %c0_i32_0 = arith.constant 0 : i32
    %c0_i32_1 = arith.constant 0 : i32
    return %c0_i32, %c0_i32_0 : i32, i32
  }
  func.func @transform_4(%arg0: i32) -> (i32, i32) {
    %c0_i32 = arith.constant 0 : i32
    %c0_i32_0 = arith.constant 0 : i32
    %c0_i32_1 = arith.constant 0 : i32
    return %c0_i32, %c0_i32_0 : i32, i32
  }
  func.func @transform_5(%arg0: i32) -> (i32, i32) {
    %c0_i32 = arith.constant 0 : i32
    %c0_i32_0 = arith.constant 0 : i32
    %c0_i32_1 = arith.constant 0 : i32
    return %c0_i32, %c0_i32_0 : i32, i32
  }
  func.func @transform_6(%arg0: i32) -> (i32, i32) {
    %c0_i32 = arith.constant 0 : i32
    %c0_i32_0 = arith.constant 0 : i32
    %c0_i32_1 = arith.constant 0 : i32
    return %c0_i32, %c0_i32_0 : i32, i32
  }
  func.func @transform_7(%arg0: i32) -> (i32, i32) {
    %c0_i32 = arith.constant 0 : i32
    %c0_i32_0 = arith.constant 0 : i32
    %c0_i32_1 = arith.constant 0 : i32
    return %c0_i32, %c0_i32_0 : i32, i32
  }
  func.func @transform_8(%arg0: i32) -> (i32, i32) {
    %c0_i32 = arith.constant 0 : i32
    %c0_i32_0 = arith.constant 0 : i32
    return %arg0, %c0_i32 : i32, i32
  }
}

</mosaic_0001>

<bundles_post_ra>
// kernel: decoder_forward.1
= control target key start
LH: loop header
LB: loop body
LE: loop exit
PB: predicated region body
PF: predicated region fallthrough
CT: control target
= control target key end

     0   :  { %13 = vsyncpa [#allocation3], 0  ;;  %s544_s0 = inlined_call_operand.vmem [shape: f32[8,24], index: 0, kind: input, shape index: {}]   ;;  %s545_s1 = inlined_call_operand.vmem [shape: bf16[24,64], index: 1, kind: input, shape index: {}]   ;;  %s546_s2 = inlined_call_operand.vmem [shape: f32[1,32], index: 2, kind: input, shape index: {}]   ;;  %s547_s3 = inlined_call_operand.vmem [shape: f32[1,32], index: 3, kind: input, shape index: {}]   ;;  %s548_s4 = inlined_call_operand.vmem [shape: bf16[32,32], index: 4, kind: input, shape index: {}]   ;;  %s549_s5 = inlined_call_operand.hbm [shape: f32[1,32], index: 5, kind: input, shape index: {}]   ;;  %s550_s6 = inlined_call_operand.vmem [shape: bf16[32,128], index: 6, kind: input, shape index: {}]   ;;  %s551_s7 = inlined_call_operand.hbm [shape: f32[1,128], index: 7, kind: input, shape index: {}]   ;;  %s552_s8 = inlined_call_operand.hbm [shape: f32[8,128], index: 8, kind: output, shape index: {}]  }
   0x1   :  { %14 = vsyncpa [#allocation6], 0 }
   0x2   :  { %15 = vsyncpa [#allocation4], 0  ;;  %s425_s27 = smov [#allocation2]   ;;  %s426_s29 = smov [#allocation5]  }
   0x3   :  { %s32_s28 = sshll.u32 %s425_s27, 4  ;;  %s44_s30 = sshll.u32 %s426_s29, 4  ;;  %s33_s28 = int_to_ptr.vmem [resolvable:$true] %s32_s28  ;;  %s45_s30 = int_to_ptr.vmem [resolvable:$true] %s44_s30 }
   0x4   :  { %s353_s11 = scalar_lea.hbm %s549_s5, 16 }
   0x5   :  { %p354_p0 = scmp.ne.s32.totalorder %s549_s5, %s353_s11  ;;  %p357_p1 = scmp.lt.u32.totalorder %s353_s11, %s549_s5 }
   0x7   :  { %p359_p2 = pnand %p357_p1, %p354_p0 }
   0x9   :  { %362 = shalt.err (!%p359_p2)
}
   0xa   :  { %s363_s16 = scalar_lea.vmem %s33_s28, 16  ;;  %s367_s17 = scalar_lea.vmem %s33_s28, 32 }
   0xb   :  { %p364_p3 = scmp.ne.s32.totalorder %s33_s28, %s363_s16  ;;  %p368_p4 = scmp.lt.s32.totalorder %s33_s28, %s33_s28 }
   0xc   :  { %p369_p5 = scmp.lt.s32.totalorder %s367_s17, %s363_s16 }
   0xe   :  { %p370_p6 = por %p369_p5, %p368_p4 }
  0x10   :  { %p371_p7 = pnand %p370_p6, %p364_p3 }
  0x12   :  { %374 = shalt.err (!%p371_p7)
}
  0x13   :  { %35 = dma.hbm_to_vmem [thread:$0]  %s549_s5, 16, %s33_s28, [#allocation3]  }
  0x14   :  { %s375_s22 = scalar_lea.hbm %s551_s7, 16 }
  0x15   :  { %p376_p8 = scmp.ne.s32.totalorder %s551_s7, %s375_s22  ;;  %p379_p9 = scmp.lt.u32.totalorder %s375_s22, %s551_s7 }
  0x17   :  { %p381_p10 = pnand %p379_p9, %p376_p8 }
  0x19   :  { %384 = shalt.err (!%p381_p10)
}
  0x1a   :  { %s385_s27 = scalar_lea.vmem %s45_s30, 16  ;;  %s389_s29 = scalar_lea.vmem %s45_s30, 32 }
  0x1b   :  { %p386_p11 = scmp.ne.s32.totalorder %s45_s30, %s385_s27  ;;  %p390_p12 = scmp.lt.s32.totalorder %s45_s30, %s45_s30 }
  0x1c   :  { %p391_p13 = scmp.lt.s32.totalorder %s389_s29, %s385_s27 }
  0x1e   :  { %p392_p0 = por %p391_p13, %p390_p12 }
  0x20   :  { %p393_p1 = pnand %p392_p0, %p386_p11 }
  0x22   :  { %396 = shalt.err (!%p393_p1)
}
  0x23   :  { %47 = dma.hbm_to_vmem [thread:$0]  %s551_s7, 16, %s45_s30, [#allocation6]  }
  0x24   :  { %419 = dma.done.wait [#allocation3], 16  }
  0x25   :  { %420 = vsyncadd [#allocation3], 4294967280 }
  0x26   :  { %421 = dma.done.wait [#allocation6], 16  }
  0x27   :  { %422 = vsyncadd [#allocation6], 4294967280  ;;  %v427_v0 = vmov 0.0   ;;  %vm428_vm0 = vmmov 0   ;;  %v347_v1 = vld [vmem:[%s545_s1] sm:$0xff]   ;;  %vm74_vm1 = vcmask 1043456  }
  0x28   :  { %317 = vmatprep.subr.bf16.mxu0 %v427_v0  ;;  %321 = vmatprep.mubr.msk.bf16.mxu0 %vm428_vm0, %v427_v0  ;;  %v348_v2 = vld [vmem:[%s545_s1 + $0x8] ss:$0 sps:$4 sm:$0xff]   ;;  %v55_v3 = vld [vmem:[%s544_s0] sm:$0xff]  ;;  %vm70_vm2 = vcmask 195584   ;;  %s429_s19 = smov 96   ;;  %vm156_vm3 = vcmask 261120  }
  0x29   :  { %325 = vmatprep.subr.bf16.mxu1 %v427_v0  ;;  %329 = vmatprep.mubr.msk.bf16.mxu1 %vm428_vm0, %v427_v0  ;;  %v76_v4 = vsel %vm74_vm1, %v348_v2, 0  ;;  %v56_v5 = vpack.c.bf16 %v55_v3, %v55_v3  ;;  %v349_v6 = vld [vmem:[%s548_s4] sm:$0xff]   ;;  %v350_v7 = vld [vmem:[%s548_s4 + $0x8] sm:$0xff]   ;;  %s430_s21 = smov [#allocation7]  }
  0x2a   :  { %318 = vmatpush3.bf16.msra.mxu0 %v347_v1  ;;  %326 = vmatpush3.bf16.msra.mxu1 %v349_v6  ;;  %v298_v8 = vld [vmem:[%s546_s2] ss:$0 sm:$0xff]  ;;  %v352_v20 = vld [vmem:[%s550_s6 + $0x8] sm:$0xff]   ;;  %v304_v33 = vld [vmem:[#allocation5] ss:$0 sm:$0xff]  ;;  %s285_s22 = sshll.u32 %s430_s21, 4  ;;  %s286_s22 = int_to_ptr.vmem [resolvable:$true] %s285_s22 }
  0x2b   :  { %319 = vmatprep.subr.bf16.mxu0 %v427_v0  ;;  %327 = vmatprep.subr.bf16.mxu1 %v427_v0  ;;  %v299_v10 = vld [vmem:[%s547_s3] ss:$0 sm:$0xff]  ;;  %p402_p3 = scmp.lt.s32.totalorder %s286_s22, %s286_s22 }
  0x2c   :  { %v351_v19 = vld [vmem:[%s550_s6] sm:$0xff]   ;;  %s397_s6 = scalar_lea.vmem %s286_s22, 128 }
  0x2d   :  { %v303_v25 = vld [vmem:[#allocation2] ss:$0 sm:$0xff]  ;;  %p398_p2 = scmp.ne.s32.totalorder %s286_s22, %s397_s6  ;;  %p403_p4 = scmp.lt.s32.totalorder %s397_s6, %s397_s6 }
  0x2e   :  { %320 = vmatpush3.bf16.msra.mxu0 %v76_v4  ;;  %328 = vmatpush3.bf16.msra.mxu1 %v350_v7 }
  0x2f   :  { %333 = vmatprep.subr.bf16.mxu0 %v427_v0  ;;  %p404_p5 = por %p403_p4, %p402_p3 }
  0x31   :  { %322 = vmatmul.mubr.msk.bf16.vlgmr.msra.gmra.mrb[0].mxu0 %vm70_vm2, %v56_v5  ;;  %p405_p6 = pnand %p404_p5, %p398_p2 }
  0x32   :  { %337 = vmatprep.mubr.msk.bf16.mxu0 %vm428_vm0, %v427_v0  ;;  %334 = vmatpush3.bf16.msra.mxu0 %v351_v19 }
  0x33   :  { %335 = vmatprep.subr.bf16.mxu0 %v427_v0 }
  0x36   :  { %336 = vmatpush3.bf16.msra.mxu0 %v352_v20 }
 0x104   :  { %v112_v9 = vpop.f32.mrb[0].mxu0 }
 0x105   :  { %v124_v11 = vmul.f32 %v298_v8, %v112_v9  ;;  %v323_v12 = vpop.f32.mrb[1].mxu0  ;;  %153 = vrot.lane.b32.xlu0 %v112_v9, %s429_s19 }
 0x106   :  { %v115_v13 = vpop.f32.mrb[2].mxu0 }
 0x107   :  { %v132_v14 = vadd.f32 %v299_v10, %v124_v11  ;;  %v324_v15 = vpop.f32.mrb[3].mxu0 }
 0x109   :  { %v133_v16 = vmul.f32 0.2, %v132_v14 }
 0x10b   :  { %v134_v17 = vmax.f32 %v132_v14, %v133_v16 }
 0x10d   :  { %v135_v18 = vpack.c.bf16 %v134_v17, %v134_v17 }
 0x10f   :  { %330 = vmatmul.mubr.msk.bf16.vlgmr.msra.gmra.mrb[0].mxu1 %vm156_vm3, %v135_v18 }
 0x177   :  { %v154_v21 = vpop.permute.xlu0 %153 }
 0x1e2   :  { %v194_v22 = vpop.f32.mrb[0].mxu1 }
 0x1e3   :  { %v195_v23 = vadd.f32 %v194_v22, %v154_v21  ;;  %v331_v24 = vpop.f32.mrb[1].mxu1 }
 0x1e4   :  { %v197_v26 = vpop.f32.mrb[2].mxu1 }
 0x1e5   :  { %v200_v27 = vmul.f32 %v298_v8, %v195_v23  ;;  %v332_v28 = vpop.f32.mrb[3].mxu1 }
 0x1e7   :  { %v208_v29 = vadd.f32 %v303_v25, %v200_v27 }
 0x1e9   :  { %v209_v30 = vmul.f32 0.2, %v208_v29 }
 0x1eb   :  { %v210_v31 = vmax.f32 %v208_v29, %v209_v30 }
 0x1ed   :  { %v211_v32 = vpack.c.bf16 %v210_v31, %v210_v31 }
 0x1ef   :  { %338 = vmatmul.mubr.msk.bf16.vlgmr.msra.gmra.mrb[4].mxu0 %vm156_vm3, %v211_v32 }
 0x2c2   :  { %v272_v34 = vpop.f32.mrb[4].mxu0 }
 0x2c3   :  { %v273_v35 = vadd.f32 %v304_v33, %v272_v34  ;;  %v339_v36 = vpop.f32.mrb[5].mxu0 }
 0x2c4   :  { %v275_v37 = vpop.f32.mrb[6].mxu0 }
 0x2c5   :  { %278 = vst [vmem:[#allocation7] sm:$0xff] %v273_v35  ;;  %v340_v38 = vpop.f32.mrb[7].mxu0 }
 0x2c6   :  { %408 = shalt.err (!%p405_p6)
}
 0x2c7   :  { %s409_s25 = scalar_lea.hbm %s552_s8, 128 }
 0x2c8   :  { %p410_p7 = scmp.ne.s32.totalorder %s552_s8, %s409_s25  ;;  %p413_p8 = scmp.lt.u32.totalorder %s409_s25, %s552_s8 }
 0x2ca   :  { %p415_p9 = pnand %p413_p8, %p410_p7 }
 0x2cc   :  { %418 = shalt.err (!%p415_p9)
}
 0x2cd   :  { %288 = dma.vmem_to_hbm [thread:$0]  %s286_s22, 128, %s552_s8, [#allocation4]  }
 0x2ce   :  { %423 = dma.done.wait [#allocation4], 128  }
 0x2cf   :  { %424 = vsyncadd [#allocation4], 4294967168 }
 0x2d0   :  { %292 = vsyncpa [#allocation3], 1 }
 0x2d1   :  { %293 = vsyncpa [#allocation6], 1 }
 0x2d2   :  { %294 = vsyncpa [#allocation4], 1 }

</bundles_post_ra>
